<compile_context>
chip_gen: v7x
topology: tpu7x:2x2x1
jax: 0.10.0
libtpu: 0.0.40
codegen_flags: <defaults>
</compile_context>

<pallas_src>
from functools import partial

import jax
import jax.numpy as jnp
from jax.experimental import pallas as pl
from jax.experimental.pallas import tpu as pltpu

_EPS = 1e-5


def _res_block_kernel(x_ref, w1_ref, w2_ref, g1_ref, b1_ref, g2_ref, b2_ref,
                      sel_ref, selt_ref, o_ref, pad_scr):
    B, H, WC = x_ref.shape
    C = sel_ref.shape[1]
    W = WC // C
    N = B * H
    inv_n = 1.0 / float(N * W)   # BN normalizer over B*H*W samples per channel

    # ---- in-kernel padding: zero only the 1-row top/bottom halo, fill interior.
    #      Width padding is encoded in the banded weights, so no lane halo needed.
    zero_row = jnp.zeros((B, 1, WC), jnp.float32)
    pad_scr[:, 0:1, :] = zero_row
    pad_scr[:, H + 1:H + 2, :] = zero_row
    pad_scr[:, 1:1 + H, :] = x_ref[...]

    def conv3x3(w_ref):
        # 3 MXU matmuls (one per kernel row); all kw taps + width zero-padding
        # live inside the banded (W*C, W*C) weight matrix.
        acc = jnp.zeros((N, WC), jnp.float32)
        for dy in range(3):
            rows = pad_scr[:, dy:dy + H, :].reshape(N, WC)
            acc = acc + jnp.dot(rows, w_ref[dy],
                                preferred_element_type=jnp.float32)
        return acc

    def bn_scale_shift(acc, g_ref, b_ref):
        # Training-mode BatchNorm2d with biased batch variance, fused into
        # a single scale/shift applied to the conv accumulator.
        rsum = jnp.sum(acc, axis=0, keepdims=True)           # (1, W*C)
        rsq = jnp.sum(acc * acc, axis=0, keepdims=True)      # (1, W*C)
        ch_sum = jnp.dot(rsum, sel_ref[...], preferred_element_type=jnp.float32)
        ch_sq = jnp.dot(rsq, sel_ref[...], preferred_element_type=jnp.float32)
        mean = ch_sum * inv_n                                # (1, C)
        var = ch_sq * inv_n - mean * mean                    # E[x^2] - mean^2
        sc = g_ref[...] * jax.lax.rsqrt(var + _EPS)          # (1, C)
        sh = b_ref[...] - mean * sc                          # (1, C)
        scale = jnp.dot(sc, selt_ref[...], preferred_element_type=jnp.float32)
        shift = jnp.dot(sh, selt_ref[...], preferred_element_type=jnp.float32)
        return scale, shift                                  # (1, W*C) each

    # ---- conv1 -> BN1 -> ReLU ----
    acc1 = conv3x3(w1_ref)
    s1, t1 = bn_scale_shift(acc1, g1_ref, b1_ref)
    y1 = jnp.maximum(acc1 * s1 + t1, 0.0)

    # Reuse the padded scratch for conv2's input (halo rows are still zero).
    pad_scr[:, 1:1 + H, :] = y1.reshape(B, H, WC)

    # ---- conv2 -> BN2 -> residual add -> ReLU ----
    acc2 = conv3x3(w2_ref)
    s2, t2 = bn_scale_shift(acc2, g2_ref, b2_ref)
    out = jnp.maximum(acc2 * s2 + t2 + x_ref[...].reshape(N, WC), 0.0)
    o_ref[...] = out.reshape(B, H, WC)


def _band_weights(w_oihw, W):
    """PyTorch conv weight (Cout, Cin, 3, 3) -> (3, W*C, W*C) banded matrices.

    mat[kh][(w + kw - 1)*C + cin, w*C + cout] = w[cout, cin, kh, kw].
    Width taps falling outside [0, W) are simply dropped == zero padding.
    """
    C = w_oihw.shape[0]
    wt = jnp.transpose(w_oihw, (2, 3, 1, 0)).astype(jnp.float32)   # (kh, kw, Cin, Cout)
    shifts = jnp.stack([jnp.eye(W, k=1 - kw, dtype=jnp.float32) for kw in range(3)])
    m = jnp.einsum('xpq,yxio->ypiqo', shifts, wt)                  # (3, W, Cin, W, Cout)
    return m.reshape(3, W * C, W * C)


@jax.jit
def res_block(x_nchw, w1, g1, b1, w2, g2, b2):
    """x_nchw: (B, C, H, W) f32; w*: (C, C, 3, 3) PyTorch OIHW; g*/b*: (C,)."""
    B, C, H, W = x_nchw.shape
    WC = W * C
    # NCHW -> lane-dense (B, H, W*C) layout (single fused transpose+reshape).
    x = jnp.transpose(x_nchw, (0, 2, 3, 1)).reshape(B, H, WC).astype(jnp.float32)
    w1b = _band_weights(w1, W)
    w2b = _band_weights(w2, W)
    eye_c = jnp.eye(C, dtype=jnp.float32)
    sel = jnp.tile(eye_c, (W, 1))      # (W*C, C): per-channel reduction selector
    selt = jnp.tile(eye_c, (1, W))     # (C, W*C): per-channel broadcast selector
    g1r = g1.reshape(1, C).astype(jnp.float32)
    b1r = b1.reshape(1, C).astype(jnp.float32)
    g2r = g2.reshape(1, C).astype(jnp.float32)
    b2r = b2.reshape(1, C).astype(jnp.float32)

    # TODO(synk): for large B*H*W, tile the grid over batch/row blocks with a
    # two-pass scheme (conv + partial BN sums, then normalize) so the batch
    # statistics stay global; the single-step grid is correct here and the
    # whole working set is a few tens of KiB of VMEM.
    out = pl.pallas_call(
        _res_block_kernel,
        out_shape=jax.ShapeDtypeStruct((B, H, WC), jnp.float32),
        grid=(1,),
        in_specs=[
            pl.BlockSpec((B, H, WC), lambda i: (0, 0, 0)),    # x (also the shortcut)
            pl.BlockSpec((3, WC, WC), lambda i: (0, 0, 0)),   # conv1 banded weights
            pl.BlockSpec((3, WC, WC), lambda i: (0, 0, 0)),   # conv2 banded weights
            pl.BlockSpec((1, C), lambda i: (0, 0)),           # bn1 gamma
            pl.BlockSpec((1, C), lambda i: (0, 0)),           # bn1 beta
            pl.BlockSpec((1, C), lambda i: (0, 0)),           # bn2 gamma
            pl.BlockSpec((1, C), lambda i: (0, 0)),           # bn2 beta
            pl.BlockSpec((WC, C), lambda i: (0, 0)),          # channel-sum selector
            pl.BlockSpec((C, WC), lambda i: (0, 0)),          # channel-broadcast selector
        ],
        out_specs=pl.BlockSpec((B, H, WC), lambda i: (0, 0, 0)),
        scratch_shapes=[pltpu.VMEM((B, H + 2, WC), jnp.float32)],
        compiler_params=pltpu.CompilerParams(dimension_semantics=("arbitrary",)),
    )(x, w1b, w2b, g1r, b1r, g2r, b2r, sel, selt)
    return jnp.transpose(out.reshape(B, H, W, C), (0, 3, 1, 2))


def _ref_forward(x, w1, g1, b1, w2, g2, b2):
    """Pure-JAX reference matching PyTorch training-mode forward (NCHW)."""
    def conv(y, w):
        return jax.lax.conv_general_dilated(
            y, w, window_strides=(1, 1), padding=((1, 1), (1, 1)),
            dimension_numbers=("NCHW", "OIHW", "NCHW"))

    def bn(y, g, b):
        m = jnp.mean(y, axis=(0, 2, 3), keepdims=True)
        v = jnp.mean((y - m) ** 2, axis=(0, 2, 3), keepdims=True)
        return (y - m) * jax.lax.rsqrt(v + _EPS) * g.reshape(1, -1, 1, 1) + b.reshape(1, -1, 1, 1)

    out = jnp.maximum(bn(conv(x, w1), g1, b1), 0.0)
    out = bn(conv(out, w2), g2, b2)
    return jnp.maximum(out + x, 0.0)


if __name__ == "__main__":
    B, C, H, W = 2, 4, 16, 16
    key = jax.random.PRNGKey(0)
    kx, k1, k2, kg1, kb1, kg2, kb2 = jax.random.split(key, 7)

    x = jax.random.normal(kx, (B, C, H, W), jnp.float32)
    fan = 9 * C
    w1 = jax.random.normal(k1, (C, C, 3, 3), jnp.float32) / jnp.sqrt(fan)
    w2 = jax.random.normal(k2, (C, C, 3, 3), jnp.float32) / jnp.sqrt(fan)
    g1 = 1.0 + 0.1 * jax.random.normal(kg1, (C,), jnp.float32)
    b1 = 0.1 * jax.random.normal(kb1, (C,), jnp.float32)
    g2 = 1.0 + 0.1 * jax.random.normal(kg2, (C,), jnp.float32)
    b2 = 0.1 * jax.random.normal(kb2, (C,), jnp.float32)

    out = jax.block_until_ready(res_block(x, w1, g1, b1, w2, g2, b2))

    ref = _ref_forward(x, w1, g1, b1, w2, g2, b2)
    assert out.shape == (B, C, H, W)
    err = float(jnp.max(jnp.abs(out - ref)))
    assert jnp.allclose(out, ref, atol=5e-4, rtol=5e-4), err
    print("KERNEL_OK")
</pallas_src>

<mosaic_0001>
module attributes {stable_mosaic.version = 11 : i64} {
  func.func @_res_block_kernel(%arg0: i32, %arg1: memref<2x16x64xf32, #tpu.memory_space<vmem>>, %arg2: memref<3x64x64xf32, #tpu.memory_space<vmem>>, %arg3: memref<3x64x64xf32, #tpu.memory_space<vmem>>, %arg4: memref<1x4xf32, #tpu.memory_space<vmem>>, %arg5: memref<1x4xf32, #tpu.memory_space<vmem>>, %arg6: memref<1x4xf32, #tpu.memory_space<vmem>>, %arg7: memref<1x4xf32, #tpu.memory_space<vmem>>, %arg8: memref<64x4xf32, #tpu.memory_space<vmem>>, %arg9: memref<4x64xf32, #tpu.memory_space<vmem>>, %arg10: memref<2x16x64xf32, #tpu.memory_space<vmem>>, %arg11: memref<2x18x64xf32, #tpu.memory_space<vmem>>) attributes {dimension_semantics = [#tpu.dimension_semantics<arbitrary>], iteration_bounds = array<i64: 1>, scalar_prefetch = 0 : i64, scratch_operands = 1 : i64, tpu.core_type = #tpu.core_type<tc>, window_params = [{pipeline_mode = #tpu.pipeline_mode<synchronous>, transform_indices = @transform_0, window_bounds = array<i64: 2, 16, 64>}, {pipeline_mode = #tpu.pipeline_mode<synchronous>, transform_indices = @transform_1, window_bounds = array<i64: 3, 64, 64>}, {pipeline_mode = #tpu.pipeline_mode<synchronous>, transform_indices = @transform_2, window_bounds = array<i64: 3, 64, 64>}, {pipeline_mode = #tpu.pipeline_mode<synchronous>, transform_indices = @transform_3, window_bounds = array<i64: 1, 4>}, {pipeline_mode = #tpu.pipeline_mode<synchronous>, transform_indices = @transform_4, window_bounds = array<i64: 1, 4>}, {pipeline_mode = #tpu.pipeline_mode<synchronous>, transform_indices = @transform_5, window_bounds = array<i64: 1, 4>}, {pipeline_mode = #tpu.pipeline_mode<synchronous>, transform_indices = @transform_6, window_bounds = array<i64: 1, 4>}, {pipeline_mode = #tpu.pipeline_mode<synchronous>, transform_indices = @transform_7, window_bounds = array<i64: 64, 4>}, {pipeline_mode = #tpu.pipeline_mode<synchronous>, transform_indices = @transform_8, window_bounds = array<i64: 4, 64>}, {pipeline_mode = #tpu.pipeline_mode<synchronous>, transform_indices = @transform_9, window_bounds = array<i64: 2, 16, 64>}]} {
    %cst = arith.constant 0.000000e+00 : f32
    %0 = vector.broadcast %cst : f32 to vector<2x1x64xf32>
    %c0 = arith.constant 0 : index
    %c0_0 = arith.constant 0 : index
    %c0_1 = arith.constant 0 : index
    %1 = vector.load %arg11[%c0, %c0_0, %c0_1] : memref<2x18x64xf32, #tpu.memory_space<vmem>>, vector<2x1x64xf32>
    tpu.vector_store %arg11[%c0, %c0_0, %c0_1], %0 {strides = array<i32>} : memref<2x18x64xf32, #tpu.memory_space<vmem>>, vector<2x1x64xf32>,
    %c0_2 = arith.constant 0 : index
    %c17 = arith.constant 17 : index
    %c0_3 = arith.constant 0 : index
    %2 = vector.load %arg11[%c0_2, %c17, %c0_3] : memref<2x18x64xf32, #tpu.memory_space<vmem>>, vector<2x1x64xf32>
    tpu.vector_store %arg11[%c0_2, %c17, %c0_3], %0 {strides = array<i32>} : memref<2x18x64xf32, #tpu.memory_space<vmem>>, vector<2x1x64xf32>,
    %c0_4 = arith.constant 0 : index
    %c0_5 = arith.constant 0 : index
    %c0_6 = arith.constant 0 : index
    %3 = vector.load %arg1[%c0_4, %c0_5, %c0_6] : memref<2x16x64xf32, #tpu.memory_space<vmem>>, vector<2x16x64xf32>
    %c0_7 = arith.constant 0 : index
    %c1 = arith.constant 1 : index
    %c0_8 = arith.constant 0 : index
    %4 = vector.load %arg11[%c0_7, %c1, %c0_8] : memref<2x18x64xf32, #tpu.memory_space<vmem>>, vector<2x16x64xf32>
    tpu.vector_store %arg11[%c0_7, %c1, %c0_8], %3 {strides = array<i32>} : memref<2x18x64xf32, #tpu.memory_space<vmem>>, vector<2x16x64xf32>,
    %cst_9 = arith.constant 0.000000e+00 : f32
    %5 = vector.broadcast %cst_9 : f32 to vector<32x64xf32>
    %c0_10 = arith.constant 0 : index
    %c0_11 = arith.constant 0 : index
    %c0_12 = arith.constant 0 : index
    %6 = vector.load %arg11[%c0_10, %c0_11, %c0_12] : memref<2x18x64xf32, #tpu.memory_space<vmem>>, vector<2x16x64xf32>
    %7 = vector.shape_cast %6 : vector<2x16x64xf32> to vector<32x64xf32>
    %c0_13 = arith.constant 0 : index
    %c0_14 = arith.constant 0 : index
    %c0_15 = arith.constant 0 : index
    %8 = vector.load %arg2[%c0_13, %c0_14, %c0_15] : memref<3x64x64xf32, #tpu.memory_space<vmem>>, vector<1x64x64xf32>
    %9 = vector.shape_cast %8 : vector<1x64x64xf32> to vector<64x64xf32>
    %cst_16 = arith.constant dense<0.000000e+00> : vector<32x64xf32>
    %10 = tpu.matmul %7, %9, %cst_16 {dimension_numbers = #tpu.dot_dimension_numbers<[1], [0], [0], [1], [0, 0, 1, 1], [], []>} : vector<32x64xf32>, vector<64x64xf32>, vector<32x64xf32> -> vector<32x64xf32>
    %11 = arith.addf %5, %10 : vector<32x64xf32>
    %c0_17 = arith.constant 0 : index
    %c1_18 = arith.constant 1 : index
    %c0_19 = arith.constant 0 : index
    %12 = vector.load %arg11[%c0_17, %c1_18, %c0_19] : memref<2x18x64xf32, #tpu.memory_space<vmem>>, vector<2x16x64xf32>
    %13 = vector.shape_cast %12 : vector<2x16x64xf32> to vector<32x64xf32>
    %c1_20 = arith.constant 1 : index
    %c0_21 = arith.constant 0 : index
    %c0_22 = arith.constant 0 : index
    %14 = vector.load %arg2[%c1_20, %c0_21, %c0_22] : memref<3x64x64xf32, #tpu.memory_space<vmem>>, vector<1x64x64xf32>
    %15 = vector.shape_cast %14 : vector<1x64x64xf32> to vector<64x64xf32>
    %cst_23 = arith.constant dense<0.000000e+00> : vector<32x64xf32>
    %16 = tpu.matmul %13, %15, %cst_23 {dimension_numbers = #tpu.dot_dimension_numbers<[1], [0], [0], [1], [0, 0, 1, 1], [], []>} : vector<32x64xf32>, vector<64x64xf32>, vector<32x64xf32> -> vector<32x64xf32>
    %17 = arith.addf %11, %16 : vector<32x64xf32>
    %c0_24 = arith.constant 0 : index
    %c2 = arith.constant 2 : index
    %c0_25 = arith.constant 0 : index
    %18 = vector.load %arg11[%c0_24, %c2, %c0_25] : memref<2x18x64xf32, #tpu.memory_space<vmem>>, vector<2x16x64xf32>
    %19 = vector.shape_cast %18 : vector<2x16x64xf32> to vector<32x64xf32>
    %c2_26 = arith.constant 2 : index
    %c0_27 = arith.constant 0 : index
    %c0_28 = arith.constant 0 : index
    %20 = vector.load %arg2[%c2_26, %c0_27, %c0_28] : memref<3x64x64xf32, #tpu.memory_space<vmem>>, vector<1x64x64xf32>
    %21 = vector.shape_cast %20 : vector<1x64x64xf32> to vector<64x64xf32>
    %cst_29 = arith.constant dense<0.000000e+00> : vector<32x64xf32>
    %22 = tpu.matmul %19, %21, %cst_29 {dimension_numbers = #tpu.dot_dimension_numbers<[1], [0], [0], [1], [0, 0, 1, 1], [], []>} : vector<32x64xf32>, vector<64x64xf32>, vector<32x64xf32> -> vector<32x64xf32>
    %23 = arith.addf %17, %22 : vector<32x64xf32>
    %cst_30 = arith.constant dense<0.000000e+00> : vector<64xf32>
    %24 = vector.multi_reduction <add>, %23, %cst_30 [0] : vector<32x64xf32> to vector<64xf32>
    %25 = vector.shape_cast %24 : vector<64xf32> to vector<1x64xf32>
    %26 = arith.mulf %23, %23 : vector<32x64xf32>
    %cst_31 = arith.constant dense<0.000000e+00> : vector<64xf32>
    %27 = vector.multi_reduction <add>, %26, %cst_31 [0] : vector<32x64xf32> to vector<64xf32>
    %28 = vector.shape_cast %27 : vector<64xf32> to vector<1x64xf32>
    %c0_32 = arith.constant 0 : index
    %c0_33 = arith.constant 0 : index
    %29 = vector.load %arg8[%c0_32, %c0_33] : memref<64x4xf32, #tpu.memory_space<vmem>>, vector<64x4xf32>
    %cst_34 = arith.constant dense<0.000000e+00> : vector<1x4xf32>
    %30 = tpu.matmul %25, %29, %cst_34 {dimension_numbers = #tpu.dot_dimension_numbers<[1], [0], [0], [1], [0, 0, 1, 1], [], []>} : vector<1x64xf32>, vector<64x4xf32>, vector<1x4xf32> -> vector<1x4xf32>
    %c0_35 = arith.constant 0 : index
    %c0_36 = arith.constant 0 : index
    %31 = vector.load %arg8[%c0_35, %c0_36] : memref<64x4xf32, #tpu.memory_space<vmem>>, vector<64x4xf32>
    %cst_37 = arith.constant dense<0.000000e+00> : vector<1x4xf32>
    %32 = tpu.matmul %28, %31, %cst_37 {dimension_numbers = #tpu.dot_dimension_numbers<[1], [0], [0], [1], [0, 0, 1, 1], [], []>} : vector<1x64xf32>, vector<64x4xf32>, vector<1x4xf32> -> vector<1x4xf32>
    %cst_38 = arith.constant 0.001953125 : f32
    %33 = vector.broadcast %cst_38 : f32 to vector<1x4xf32>
    %34 = arith.mulf %30, %33 : vector<1x4xf32>
    %cst_39 = arith.constant 0.001953125 : f32
    %35 = vector.broadcast %cst_39 : f32 to vector<1x4xf32>
    %36 = arith.mulf %32, %35 : vector<1x4xf32>
    %37 = arith.mulf %34, %34 : vector<1x4xf32>
    %38 = arith.subf %36, %37 : vector<1x4xf32>
    %c0_40 = arith.constant 0 : index
    %c0_41 = arith.constant 0 : index
    %39 = vector.load %arg4[%c0_40, %c0_41] : memref<1x4xf32, #tpu.memory_space<vmem>>, vector<1x4xf32>
    %cst_42 = arith.constant 9.99999974E-6 : f32
    %40 = vector.broadcast %cst_42 : f32 to vector<1x4xf32>
    %41 = arith.addf %38, %40 : vector<1x4xf32>
    %42 = math.rsqrt %41 : vector<1x4xf32>
    %43 = arith.mulf %39, %42 : vector<1x4xf32>
    %c0_43 = arith.constant 0 : index
    %c0_44 = arith.constant 0 : index
    %44 = vector.load %arg5[%c0_43, %c0_44] : memref<1x4xf32, #tpu.memory_space<vmem>>, vector<1x4xf32>
    %45 = arith.mulf %34, %43 : vector<1x4xf32>
    %46 = arith.subf %44, %45 : vector<1x4xf32>
    %c0_45 = arith.constant 0 : index
    %c0_46 = arith.constant 0 : index
    %47 = vector.load %arg9[%c0_45, %c0_46] : memref<4x64xf32, #tpu.memory_space<vmem>>, vector<4x64xf32>
    %cst_47 = arith.constant dense<0.000000e+00> : vector<1x64xf32>
    %48 = tpu.matmul %43, %47, %cst_47 {dimension_numbers = #tpu.dot_dimension_numbers<[1], [0], [0], [1], [0, 0, 1, 1], [], []>} : vector<1x4xf32>, vector<4x64xf32>, vector<1x64xf32> -> vector<1x64xf32>
    %c0_48 = arith.constant 0 : index
    %c0_49 = arith.constant 0 : index
    %49 = vector.load %arg9[%c0_48, %c0_49] : memref<4x64xf32, #tpu.memory_space<vmem>>, vector<4x64xf32>
    %cst_50 = arith.constant dense<0.000000e+00> : vector<1x64xf32>
    %50 = tpu.matmul %46, %49, %cst_50 {dimension_numbers = #tpu.dot_dimension_numbers<[1], [0], [0], [1], [0, 0, 1, 1], [], []>} : vector<1x4xf32>, vector<4x64xf32>, vector<1x64xf32> -> vector<1x64xf32>
    %51 = vector.broadcast %48 : vector<1x64xf32> to vector<32x64xf32>
    %52 = arith.mulf %23, %51 : vector<32x64xf32>
    %53 = vector.broadcast %50 : vector<1x64xf32> to vector<32x64xf32>
    %54 = arith.addf %52, %53 : vector<32x64xf32>
    %cst_51 = arith.constant 0.000000e+00 : f32
    %55 = vector.broadcast %cst_51 : f32 to vector<32x64xf32>
    %56 = arith.maximumf %54, %55 : vector<32x64xf32>
    %57 = vector.shape_cast %56 : vector<32x64xf32> to vector<2x16x64xf32>
    %c0_52 = arith.constant 0 : index
    %c1_53 = arith.constant 1 : index
    %c0_54 = arith.constant 0 : index
    %58 = vector.load %arg11[%c0_52, %c1_53, %c0_54] : memref<2x18x64xf32, #tpu.memory_space<vmem>>, vector<2x16x64xf32>
    tpu.vector_store %arg11[%c0_52, %c1_53, %c0_54], %57 {strides = array<i32>} : memref<2x18x64xf32, #tpu.memory_space<vmem>>, vector<2x16x64xf32>,
    %cst_55 = arith.constant 0.000000e+00 : f32
    %59 = vector.broadcast %cst_55 : f32 to vector<32x64xf32>
    %c0_56 = arith.constant 0 : index
    %c0_57 = arith.constant 0 : index
    %c0_58 = arith.constant 0 : index
    %60 = vector.load %arg11[%c0_56, %c0_57, %c0_58] : memref<2x18x64xf32, #tpu.memory_space<vmem>>, vector<2x16x64xf32>
    %61 = vector.shape_cast %60 : vector<2x16x64xf32> to vector<32x64xf32>
    %c0_59 = arith.constant 0 : index
    %c0_60 = arith.constant 0 : index
    %c0_61 = arith.constant 0 : index
    %62 = vector.load %arg3[%c0_59, %c0_60, %c0_61] : memref<3x64x64xf32, #tpu.memory_space<vmem>>, vector<1x64x64xf32>
    %63 = vector.shape_cast %62 : vector<1x64x64xf32> to vector<64x64xf32>
    %cst_62 = arith.constant dense<0.000000e+00> : vector<32x64xf32>
    %64 = tpu.matmul %61, %63, %cst_62 {dimension_numbers = #tpu.dot_dimension_numbers<[1], [0], [0], [1], [0, 0, 1, 1], [], []>} : vector<32x64xf32>, vector<64x64xf32>, vector<32x64xf32> -> vector<32x64xf32>
    %65 = arith.addf %59, %64 : vector<32x64xf32>
    %c0_63 = arith.constant 0 : index
    %c1_64 = arith.constant 1 : index
    %c0_65 = arith.constant 0 : index
    %66 = vector.load %arg11[%c0_63, %c1_64, %c0_65] : memref<2x18x64xf32, #tpu.memory_space<vmem>>, vector<2x16x64xf32>
    %67 = vector.shape_cast %66 : vector<2x16x64xf32> to vector<32x64xf32>
    %c1_66 = arith.constant 1 : index
    %c0_67 = arith.constant 0 : index
    %c0_68 = arith.constant 0 : index
    %68 = vector.load %arg3[%c1_66, %c0_67, %c0_68] : memref<3x64x64xf32, #tpu.memory_space<vmem>>, vector<1x64x64xf32>
    %69 = vector.shape_cast %68 : vector<1x64x64xf32> to vector<64x64xf32>
    %cst_69 = arith.constant dense<0.000000e+00> : vector<32x64xf32>
    %70 = tpu.matmul %67, %69, %cst_69 {dimension_numbers = #tpu.dot_dimension_numbers<[1], [0], [0], [1], [0, 0, 1, 1], [], []>} : vector<32x64xf32>, vector<64x64xf32>, vector<32x64xf32> -> vector<32x64xf32>
    %71 = arith.addf %65, %70 : vector<32x64xf32>
    %c0_70 = arith.constant 0 : index
    %c2_71 = arith.constant 2 : index
    %c0_72 = arith.constant 0 : index
    %72 = vector.load %arg11[%c0_70, %c2_71, %c0_72] : memref<2x18x64xf32, #tpu.memory_space<vmem>>, vector<2x16x64xf32>
    %73 = vector.shape_cast %72 : vector<2x16x64xf32> to vector<32x64xf32>
    %c2_73 = arith.constant 2 : index
    %c0_74 = arith.constant 0 : index
    %c0_75 = arith.constant 0 : index
    %74 = vector.load %arg3[%c2_73, %c0_74, %c0_75] : memref<3x64x64xf32, #tpu.memory_space<vmem>>, vector<1x64x64xf32>
    %75 = vector.shape_cast %74 : vector<1x64x64xf32> to vector<64x64xf32>
    %cst_76 = arith.constant dense<0.000000e+00> : vector<32x64xf32>
    %76 = tpu.matmul %73, %75, %cst_76 {dimension_numbers = #tpu.dot_dimension_numbers<[1], [0], [0], [1], [0, 0, 1, 1], [], []>} : vector<32x64xf32>, vector<64x64xf32>, vector<32x64xf32> -> vector<32x64xf32>
    %77 = arith.addf %71, %76 : vector<32x64xf32>
    %cst_77 = arith.constant dense<0.000000e+00> : vector<64xf32>
    %78 = vector.multi_reduction <add>, %77, %cst_77 [0] : vector<32x64xf32> to vector<64xf32>
    %79 = vector.shape_cast %78 : vector<64xf32> to vector<1x64xf32>
    %80 = arith.mulf %77, %77 : vector<32x64xf32>
    %cst_78 = arith.constant dense<0.000000e+00> : vector<64xf32>
    %81 = vector.multi_reduction <add>, %80, %cst_78 [0] : vector<32x64xf32> to vector<64xf32>
    %82 = vector.shape_cast %81 : vector<64xf32> to vector<1x64xf32>
    %c0_79 = arith.constant 0 : index
    %c0_80 = arith.constant 0 : index
    %83 = vector.load %arg8[%c0_79, %c0_80] : memref<64x4xf32, #tpu.memory_space<vmem>>, vector<64x4xf32>
    %cst_81 = arith.constant dense<0.000000e+00> : vector<1x4xf32>
    %84 = tpu.matmul %79, %83, %cst_81 {dimension_numbers = #tpu.dot_dimension_numbers<[1], [0], [0], [1], [0, 0, 1, 1], [], []>} : vector<1x64xf32>, vector<64x4xf32>, vector<1x4xf32> -> vector<1x4xf32>
    %c0_82 = arith.constant 0 : index
    %c0_83 = arith.constant 0 : index
    %85 = vector.load %arg8[%c0_82, %c0_83] : memref<64x4xf32, #tpu.memory_space<vmem>>, vector<64x4xf32>
    %cst_84 = arith.constant dense<0.000000e+00> : vector<1x4xf32>
    %86 = tpu.matmul %82, %85, %cst_84 {dimension_numbers = #tpu.dot_dimension_numbers<[1], [0], [0], [1], [0, 0, 1, 1], [], []>} : vector<1x64xf32>, vector<64x4xf32>, vector<1x4xf32> -> vector<1x4xf32>
    %cst_85 = arith.constant 0.001953125 : f32
    %87 = vector.broadcast %cst_85 : f32 to vector<1x4xf32>
    %88 = arith.mulf %84, %87 : vector<1x4xf32>
    %cst_86 = arith.constant 0.001953125 : f32
    %89 = vector.broadcast %cst_86 : f32 to vector<1x4xf32>
    %90 = arith.mulf %86, %89 : vector<1x4xf32>
    %91 = arith.mulf %88, %88 : vector<1x4xf32>
    %92 = arith.subf %90, %91 : vector<1x4xf32>
    %c0_87 = arith.constant 0 : index
    %c0_88 = arith.constant 0 : index
    %93 = vector.load %arg6[%c0_87, %c0_88] : memref<1x4xf32, #tpu.memory_space<vmem>>, vector<1x4xf32>
    %cst_89 = arith.constant 9.99999974E-6 : f32
    %94 = vector.broadcast %cst_89 : f32 to vector<1x4xf32>
    %95 = arith.addf %92, %94 : vector<1x4xf32>
    %96 = math.rsqrt %95 : vector<1x4xf32>
    %97 = arith.mulf %93, %96 : vector<1x4xf32>
    %c0_90 = arith.constant 0 : index
    %c0_91 = arith.constant 0 : index
    %98 = vector.load %arg7[%c0_90, %c0_91] : memref<1x4xf32, #tpu.memory_space<vmem>>, vector<1x4xf32>
    %99 = arith.mulf %88, %97 : vector<1x4xf32>
    %100 = arith.subf %98, %99 : vector<1x4xf32>
    %c0_92 = arith.constant 0 : index
    %c0_93 = arith.constant 0 : index
    %101 = vector.load %arg9[%c0_92, %c0_93] : memref<4x64xf32, #tpu.memory_space<vmem>>, vector<4x64xf32>
    %cst_94 = arith.constant dense<0.000000e+00> : vector<1x64xf32>
    %102 = tpu.matmul %97, %101, %cst_94 {dimension_numbers = #tpu.dot_dimension_numbers<[1], [0], [0], [1], [0, 0, 1, 1], [], []>} : vector<1x4xf32>, vector<4x64xf32>, vector<1x64xf32> -> vector<1x64xf32>
    %c0_95 = arith.constant 0 : index
    %c0_96 = arith.constant 0 : index
    %103 = vector.load %arg9[%c0_95, %c0_96] : memref<4x64xf32, #tpu.memory_space<vmem>>, vector<4x64xf32>
    %cst_97 = arith.constant dense<0.000000e+00> : vector<1x64xf32>
    %104 = tpu.matmul %100, %103, %cst_97 {dimension_numbers = #tpu.dot_dimension_numbers<[1], [0], [0], [1], [0, 0, 1, 1], [], []>} : vector<1x4xf32>, vector<4x64xf32>, vector<1x64xf32> -> vector<1x64xf32>
    %105 = vector.broadcast %102 : vector<1x64xf32> to vector<32x64xf32>
    %106 = arith.mulf %77, %105 : vector<32x64xf32>
    %107 = vector.broadcast %104 : vector<1x64xf32> to vector<32x64xf32>
    %108 = arith.addf %106, %107 : vector<32x64xf32>
    %c0_98 = arith.constant 0 : index
    %c0_99 = arith.constant 0 : index
    %c0_100 = arith.constant 0 : index
    %109 = vector.load %arg1[%c0_98, %c0_99, %c0_100] : memref<2x16x64xf32, #tpu.memory_space<vmem>>, vector<2x16x64xf32>
    %110 = vector.shape_cast %109 : vector<2x16x64xf32> to vector<32x64xf32>
    %111 = arith.addf %108, %110 : vector<32x64xf32>
    %cst_101 = arith.constant 0.000000e+00 : f32
    %112 = vector.broadcast %cst_101 : f32 to vector<32x64xf32>
    %113 = arith.maximumf %111, %112 : vector<32x64xf32>
    %114 = vector.shape_cast %113 : vector<32x64xf32> to vector<2x16x64xf32>
    %c0_102 = arith.constant 0 : index
    %c0_103 = arith.constant 0 : index
    %c0_104 = arith.constant 0 : index
    %115 = vector.load %arg10[%c0_102, %c0_103, %c0_104] : memref<2x16x64xf32, #tpu.memory_space<vmem>>, vector<2x16x64xf32>
    tpu.vector_store %arg10[%c0_102, %c0_103, %c0_104], %114 {strides = array<i32>} : memref<2x16x64xf32, #tpu.memory_space<vmem>>, vector<2x16x64xf32>,
    return
  }
  func.func @transform_0(%arg0: i32) -> (i32, i32, i32) {
    %c0_i32 = arith.constant 0 : i32
    %c0_i32_0 = arith.constant 0 : i32
    %c0_i32_1 = arith.constant 0 : i32
    %c0_i32_2 = arith.constant 0 : i32
    return %c0_i32, %c0_i32_0, %c0_i32_1 : i32, i32, i32
  }
  func.func @transform_1(%arg0: i32) -> (i32, i32, i32) {
    %c0_i32 = arith.constant 0 : i32
    %c0_i32_0 = arith.constant 0 : i32
    %c0_i32_1 = arith.constant 0 : i32
    %c0_i32_2 = arith.constant 0 : i32
    return %c0_i32, %c0_i32_0, %c0_i32_1 : i32, i32, i32
  }
  func.func @transform_2(%arg0: i32) -> (i32, i32, i32) {
    %c0_i32 = arith.constant 0 : i32
    %c0_i32_0 = arith.constant 0 : i32
    %c0_i32_1 = arith.constant 0 : i32
    %c0_i32_2 = arith.constant 0 : i32
    return %c0_i32, %c0_i32_0, %c0_i32_1 : i32, i32, i32
  }
  func.func @transform_3(%arg0: i32) -> (i32, i32) {
    %c0_i32 = arith.constant 0 : i32
    %c0_i32_0 = arith.constant 0 : i32
    %c0_i32_1 = arith.constant 0 : i32
    return %c0_i32, %c0_i32_0 : i32, i32
  }
  func.func @transform_4(%arg0: i32) -> (i32, i32) {
    %c0_i32 = arith.constant 0 : i32
    %c0_i32_0 = arith.constant 0 : i32
    %c0_i32_1 = arith.constant 0 : i32
    return %c0_i32, %c0_i32_0 : i32, i32
  }
  func.func @transform_5(%arg0: i32) -> (i32, i32) {
    %c0_i32 = arith.constant 0 : i32
    %c0_i32_0 = arith.constant 0 : i32
    %c0_i32_1 = arith.constant 0 : i32
    return %c0_i32, %c0_i32_0 : i32, i32
  }
  func.func @transform_6(%arg0: i32) -> (i32, i32) {
    %c0_i32 = arith.constant 0 : i32
    %c0_i32_0 = arith.constant 0 : i32
    %c0_i32_1 = arith.constant 0 : i32
    return %c0_i32, %c0_i32_0 : i32, i32
  }
  func.func @transform_7(%arg0: i32) -> (i32, i32) {
    %c0_i32 = arith.constant 0 : i32
    %c0_i32_0 = arith.constant 0 : i32
    %c0_i32_1 = arith.constant 0 : i32
    return %c0_i32, %c0_i32_0 : i32, i32
  }
  func.func @transform_8(%arg0: i32) -> (i32, i32) {
    %c0_i32 = arith.constant 0 : i32
    %c0_i32_0 = arith.constant 0 : i32
    %c0_i32_1 = arith.constant 0 : i32
    return %c0_i32, %c0_i32_0 : i32, i32
  }
  func.func @transform_9(%arg0: i32) -> (i32, i32, i32) {
    %c0_i32 = arith.constant 0 : i32
    %c0_i32_0 = arith.constant 0 : i32
    %c0_i32_1 = arith.constant 0 : i32
    %c0_i32_2 = arith.constant 0 : i32
    return %c0_i32, %c0_i32_0, %c0_i32_1 : i32, i32, i32
  }
}

</mosaic_0001>

<bundles_post_ra>
// kernel: tile.19
= control target key start
LH: loop header
LB: loop body
LE: loop exit
PB: predicated region body
PF: predicated region fallthrough
CT: control target
= control target key end

     0   :  { %vm6_vm0 = vcmask 1043458   ;;  %s11_s6 = smov 3  ;;  %s14_s7 = smov 12  ;;  %vm8_vm1 = vcmask 31744   ;;  %vm20_vm2 = vcmask 523744   ;;  %vm32_vm3 = vcmask 490944   ;;  %s381_s0 = inlined_call_operand.vmem [shape: f32[4,16,4], index: 0, kind: input, shape index: {}]   ;;  %s382_s1 = inlined_call_operand.vmem [shape: f32[4,64], index: 1, kind: output, shape index: {}]  }
   0x1   :  { %v196_v0 = vld [vmem:[%s381_s0 + $0xf] ss:$16 sm:%s11_s6]   ;;  %s35_s12 = smov 3  ;;  %s38_s15 = smov 12  ;;  %vm44_vm4 = vcmask 458144   ;;  %vm56_vm5 = vcmask 425344  }
   0x2   :  { %v197_v1 = vld [vmem:[%s381_s0 + $0xf] ss:$16 sm:%s14_s7]   ;;  %v200_v3 = vld [vmem:[%s381_s0 + $0xd] ss:$16 sm:%s35_s12]   ;;  %s241_s16 = smov 60   ;;  %s23_s19 = smov 3 }
   0x3   :  { %v17_v2 = vsel %vm6_vm0, %v197_v1, %v196_v0  ;;  %v201_v4 = vld [vmem:[%s381_s0 + $0xd] ss:$16 sm:%s38_s15]   ;;  %s26_s20 = smov 12  ;;  %v198_v6 = vld [vmem:[%s381_s0 + $0xe] ss:$16 sm:%s23_s19]   ;;  %s47_s25 = smov 3 }
   0x4   :  { %18 = vrot.lane.b32.xlu0 %v17_v2, %s241_s16  ;;  %v41_v5 = vsel %vm6_vm0, %v201_v4, %v200_v3  ;;  %v199_v7 = vld [vmem:[%s381_s0 + $0xe] ss:$16 sm:%s26_s20]   ;;  %s242_s26 = smov 52   ;;  %s50_s29 = smov 12  ;;  %vm68_vm6 = vcmask 392544   ;;  %vm80_vm7 = vcmask 359744  }
   0x5   :  { %42 = vrot.lane.b32.xlu1 %v41_v5, %s242_s26  ;;  %v29_v8 = vsel %vm6_vm0, %v199_v7, %v198_v6  ;;  %v202_v9 = vld [vmem:[%s381_s0 + $0xc] ss:$16 sm:%s47_s25]   ;;  %s59_s3 = smov 3  ;;  %s62_s4 = smov 12  ;;  %vm92_vm8 = vcmask 326944   ;;  %vm104_vm9 = vcmask 294144  }
   0x6   :  { %v203_v10 = vld [vmem:[%s381_s0 + $0xc] ss:$16 sm:%s50_s29]   ;;  %s243_s5 = smov 56   ;;  %v204_v12 = vld [vmem:[%s381_s0 + $0xb] ss:$16 sm:%s59_s3]   ;;  %s71_s8 = smov 3 }
   0x7   :  { %v53_v11 = vsel %vm6_vm0, %v203_v10, %v202_v9  ;;  %v205_v13 = vld [vmem:[%s381_s0 + $0xb] ss:$16 sm:%s62_s4]   ;;  %v206_v14 = vld [vmem:[%s381_s0 + $0xa] ss:$16 sm:%s71_s8]   ;;  %s74_s13 = smov 12  ;;  %s244_s14 = smov 48  }
   0x8   :  { %30 = vrot.lane.b32.xlu0 %v29_v8, %s243_s5  ;;  %v65_v15 = vsel %vm6_vm0, %v205_v13, %v204_v12  ;;  %v207_v16 = vld [vmem:[%s381_s0 + $0xa] ss:$16 sm:%s74_s13]   ;;  %s83_s17 = smov 3  ;;  %s86_s18 = smov 12  ;;  %vm116_vm10 = vcmask 261344   ;;  %vm128_vm11 = vcmask 228544  }
   0x9   :  { %54 = vrot.lane.b32.xlu1 %v53_v11, %s244_s14  ;;  %v77_v17 = vsel %vm6_vm0, %v207_v16, %v206_v14  ;;  %v208_v18 = vld [vmem:[%s381_s0 + $0x9] ss:$16 sm:%s83_s17]   ;;  %s95_s23 = smov 3  ;;  %s245_s24 = smov 44   ;;  %vm140_vm12 = vcmask 195744   ;;  %vm152_vm13 = vcmask 162944  }
   0xa   :  { %v209_v19 = vld [vmem:[%s381_s0 + $0x9] ss:$16 sm:%s86_s18]   ;;  %v210_v20 = vld [vmem:[%s381_s0 + $0x8] ss:$16 sm:%s95_s23]   ;;  %s98_s27 = smov 12  ;;  %s107_s30 = smov 3 }
   0xb   :  { %v89_v21 = vsel %vm6_vm0, %v209_v19, %v208_v18  ;;  %v211_v22 = vld [vmem:[%s381_s0 + $0x8] ss:$16 sm:%s98_s27]   ;;  %s110_s2 = smov 12  ;;  %s246_s3 = smov 40   ;;  %v212_v23 = vld [vmem:[%s381_s0 + $0x7] ss:$16 sm:%s107_s30]  }
   0xc   :  { %66 = vrot.lane.b32.xlu0 %v65_v15, %s245_s24  ;;  %s119_s6 = smov 3  ;;  %v101_v24 = vsel %vm6_vm0, %v211_v22, %v210_v20  ;;  %v213_v25 = vld [vmem:[%s381_s0 + $0x7] ss:$16 sm:%s110_s2]   ;;  %s122_s11 = smov 12  ;;  %vm164_vm14 = vcmask 130144   ;;  %vm176_vm15 = vcmask 97344  }
   0xd   :  { %78 = vrot.lane.b32.xlu1 %v77_v17, %s246_s3  ;;  %v214_v26 = vld [vmem:[%s381_s0 + $0x6] ss:$16 sm:%s119_s6]   ;;  %s247_s12 = smov 36   ;;  %s131_s15 = smov 3  ;;  %v113_v28 = vsel %vm6_vm0, %v213_v25, %v212_v23 }
   0xe   :  { %v215_v27 = vld [vmem:[%s381_s0 + $0x6] ss:$16 sm:%s122_s11]   ;;  %s134_s16 = smov 12  ;;  %v216_v29 = vld [vmem:[%s381_s0 + $0x5] ss:$16 sm:%s131_s15]   ;;  %s143_s19 = smov 3 }
   0xf   :  { %s248_s20 = smov 32   ;;  %v217_v30 = vld [vmem:[%s381_s0 + $0x5] ss:$16 sm:%s134_s16]   ;;  %s146_s23 = smov 12  ;;  %v125_v31 = vsel %vm6_vm0, %v215_v27, %v214_v26  ;;  %v218_v32 = vld [vmem:[%s381_s0 + $0x4] ss:$16 sm:%s143_s19]  }
  0x10   :  { %90 = vrot.lane.b32.xlu0 %v89_v21, %s247_s12  ;;  %s155_s26 = smov 3  ;;  %s158_s27 = smov 12  ;;  %v219_v33 = vld [vmem:[%s381_s0 + $0x4] ss:$16 sm:%s146_s23]   ;;  %v137_v34 = vsel %vm6_vm0, %v217_v30, %v216_v29 }
  0x11   :  { %102 = vrot.lane.b32.xlu1 %v101_v24, %s248_s20  ;;  %s249_s28 = smov 28   ;;  %s167_s2 = smov 3  ;;  %v220_v35 = vld [vmem:[%s381_s0 + $0x3] ss:$16 sm:%s155_s26]   ;;  %v149_v37 = vsel %vm6_vm0, %v219_v33, %v218_v32 }
  0x12   :  { %s170_s5 = smov 12  ;;  %s250_s6 = smov 24   ;;  %v221_v36 = vld [vmem:[%s381_s0 + $0x3] ss:$16 sm:%s158_s27]   ;;  %v222_v38 = vld [vmem:[%s381_s0 + $0x2] ss:$16 sm:%s167_s2]  }
  0x13   :  { %s179_s9 = smov 3  ;;  %v223_v39 = vld [vmem:[%s381_s0 + $0x2] ss:$16 sm:%s170_s5]   ;;  %s182_s14 = smov 12  ;;  %v161_v41 = vsel %vm6_vm0, %v221_v36, %v220_v35 }
  0x14   :  { %114 = vrot.lane.b32.xlu0 %v113_v28, %s249_s28  ;;  %s2_s15 = smov 3  ;;  %s251_s16 = smov 20   ;;  %v224_v42 = vld [vmem:[%s381_s0 + $0x1] ss:$16 sm:%s179_s9]   ;;  %v173_v46 = vsel %vm6_vm0, %v223_v39, %v222_v38 }
  0x15   :  { %126 = vrot.lane.b32.xlu1 %v125_v31, %s250_s6  ;;  %v3_v40 = vld [vmem:[%s381_s0] ss:$16 sm:%s2_s15]   ;;  %s4_s19 = smov 12  ;;  %s252_s24 = smov 16  }
  0x16   :  { %v5_v43 = vld [vmem:[%s381_s0] ss:$16 sm:%s4_s19]   ;;  %v225_v44 = vld [vmem:[%s381_s0 + $0x1] ss:$16 sm:%s182_s14]   ;;  %s253_s0 = smov 12   ;;  %s254_s27 = smov 8  }
  0x17   :  { %v7_v45 = vsel %vm6_vm0, %v5_v43, %v3_v40  ;;  %v185_v47 = vsel %vm6_vm0, %v225_v44, %v224_v42  ;;  %s255_s28 = smov 4   ;;  %vm188_vm0 = vcmask 64544  }
  0x18   :  { %138 = vrot.lane.b32.xlu0 %v137_v34, %s251_s16  ;;  %9 = vst.msk [vmem:[#allocation0] sm:$0xf] %vm8_vm1, %v7_v45  }
  0x19   :  { %150 = vrot.lane.b32.xlu1 %v149_v37, %s252_s24 }
  0x1c   :  { %162 = vrot.lane.b32.xlu0 %v161_v41, %s253_s0 }
  0x1d   :  { %174 = vrot.lane.b32.xlu1 %v173_v46, %s254_s27 }
  0x20   :  { %186 = vrot.lane.b32.xlu0 %v185_v47, %s255_s28 }
  0x76   :  { %v19_v48 = vpop.permute.xlu0 %18  }
  0x77   :  { %21 = vst.msk [vmem:[#allocation0] sm:$0xf] %vm20_vm2, %v19_v48   ;;  %v43_v49 = vpop.permute.xlu1 %42  }
  0x7a   :  { %v31_v50 = vpop.permute.xlu0 %30  }
  0x7b   :  { %33 = vst.msk [vmem:[#allocation0] sm:$0xf] %vm32_vm3, %v31_v50   ;;  %v55_v51 = vpop.permute.xlu1 %54  }
  0x7c   :  { %45 = vst.msk [vmem:[#allocation0] sm:$0xf] %vm44_vm4, %v43_v49  }
  0x7d   :  { %57 = vst.msk [vmem:[#allocation0] sm:$0xf] %vm56_vm5, %v55_v51  }
  0x7e   :  { %v67_v52 = vpop.permute.xlu0 %66  }
  0x7f   :  { %69 = vst.msk [vmem:[#allocation0] sm:$0xf] %vm68_vm6, %v67_v52   ;;  %v79_v53 = vpop.permute.xlu1 %78  }
  0x80   :  { %81 = vst.msk [vmem:[#allocation0] sm:$0xf] %vm80_vm7, %v79_v53  }
  0x82   :  { %v91_v54 = vpop.permute.xlu0 %90  }
  0x83   :  { %93 = vst.msk [vmem:[#allocation0] sm:$0xf] %vm92_vm8, %v91_v54   ;;  %v103_v55 = vpop.permute.xlu1 %102  }
  0x84   :  { %105 = vst.msk [vmem:[#allocation0] sm:$0xf] %vm104_vm9, %v103_v55  }
  0x86   :  { %v115_v56 = vpop.permute.xlu0 %114  }
  0x87   :  { %117 = vst.msk [vmem:[#allocation0] sm:$0xf] %vm116_vm10, %v115_v56   ;;  %v127_v57 = vpop.permute.xlu1 %126  }
  0x88   :  { %129 = vst.msk [vmem:[#allocation0] sm:$0xf] %vm128_vm11, %v127_v57  }
  0x8a   :  { %v139_v58 = vpop.permute.xlu0 %138  }
  0x8b   :  { %141 = vst.msk [vmem:[#allocation0] sm:$0xf] %vm140_vm12, %v139_v58   ;;  %v151_v59 = vpop.permute.xlu1 %150  }
  0x8c   :  { %153 = vst.msk [vmem:[#allocation0] sm:$0xf] %vm152_vm13, %v151_v59  }
  0x8e   :  { %v163_v60 = vpop.permute.xlu0 %162  }
  0x8f   :  { %165 = vst.msk [vmem:[#allocation0] sm:$0xf] %vm164_vm14, %v163_v60   ;;  %v175_v61 = vpop.permute.xlu1 %174  }
  0x90   :  { %177 = vst.msk [vmem:[#allocation0] sm:$0xf] %vm176_vm15, %v175_v61  }
  0x92   :  { %v187_v62 = vpop.permute.xlu0 %186  }
  0x93   :  { %189 = vst.msk [vmem:[#allocation0] sm:$0xf] %vm188_vm0, %v187_v62  }
  0x9a   :  { %v193_v63 = vld [vmem:[#allocation0] sm:$0xf] }
  0x9b   :  { %195 = vst [vmem:[%s382_s1] sm:$0xf] %v193_v63 }

// kernel: res_block.1
= control target key start
LH: loop header
LB: loop body
LE: loop exit
PB: predicated region body
PF: predicated region fallthrough
CT: control target
= control target key end

     0   :  { %vm32_vm0 = vcmask 516096   ;;  %vm41_vm1 = vcmask 523264   ;;  %v2043_v3 = vmov 0.0   ;;  %v2044_v56 = vmov 0.0|0.0   ;;  %s2504_s1 = inlined_call_operand.vmem [shape: f32[3,64,64], index: 1, kind: input, shape index: {}]   ;;  %s2505_s0 = inlined_call_operand.vmem [shape: f32[2,16,64], index: 0, kind: input, shape index: {}]   ;;  %s2506_s7 = inlined_call_operand.vmem [shape: f32[64,4], index: 7, kind: input, shape index: {}]   ;;  %s2507_s8 = inlined_call_operand.vmem [shape: f32[4,64], index: 8, kind: input, shape index: {}]   ;;  %s2508_s3 = inlined_call_operand.vmem [shape: f32[1,4], index: 3, kind: input, shape index: {}]   ;;  %s2509_s4 = inlined_call_operand.vmem [shape: f32[1,4], index: 4, kind: input, shape index: {}]   ;;  %s2510_s2 = inlined_call_operand.vmem [shape: f32[3,64,64], index: 2, kind: input, shape index: {}]   ;;  %s2511_s5 = inlined_call_operand.vmem [shape: f32[1,4], index: 5, kind: input, shape index: {}]   ;;  %s2512_s6 = inlined_call_operand.vmem [shape: f32[1,4], index: 6, kind: input, shape index: {}]   ;;  %s2513_s9 = inlined_call_operand.vmem [shape: f32[2,16,64], index: 9, kind: output, shape index: {}]  }
   0x1   :  { %v1464_v0 = vld [vmem:[%s2504_s1 + $0x40] sm:$0xff]  ;;  %v1465_v1 = vld [vmem:[%s2504_s1 + $0x48] sm:$0xff]  ;;  %v1466_v2 = vld [vmem:[%s2504_s1 + $0x50] sm:$0xff]  ;;  %33 = vst.msk [vmem:[#allocation2] sm:$0x1] %vm32_vm0, %v2043_v3  ;;  %1924 = vmatprep.subr.bf16.mxu1 %v2044_v56  ;;  %vm2045_vm2 = vmmov 0  }
   0x2   :  { %34 = vst.msk [vmem:[#allocation2 + $0x18] sm:$0x1] %vm32_vm0, %v2043_v3  ;;  %35 = vst.msk [vmem:[#allocation2 + $0x11] sm:$0x1] %vm32_vm0, %v2043_v3  ;;  %v1876_v4 = vpack.c.bf16 %v1465_v1, %v1464_v0  ;;  %v1467_v5 = vld [vmem:[%s2504_s1 + $0x58] sm:$0xff]  ;;  %v1468_v7 = vld [vmem:[%s2504_s1 + $0x60] sm:$0xff]  ;;  %1730 = vmatprep.mubr.msk.f32.mxu1 %vm2045_vm2, %v2043_v3 }
   0x3   :  { %36 = vst.msk [vmem:[#allocation2 + $0x29] sm:$0x1] %vm32_vm0, %v2043_v3  ;;  %v1880_v6 = vpack.c.bf16 %v1467_v5, %v1466_v2  ;;  %v1469_v8 = vld [vmem:[%s2504_s1 + $0x68] sm:$0xff]  ;;  %v2121_v9 = vld [vmem:[%s2505_s0] sm:$0xff]  ;;  %v2135_v12 = vld [vmem:[%s2505_s0 + $0x10] sm:$0xff]  ;;  %vm579_vm3 = vcmask 1043456  }
   0x4   :  { %1877 = vmatprep.subr.bf16.mxu0 %v1876_v4  ;;  %42 = vst.msk [vmem:[#allocation2 + $0x1] sm:$0xff] %vm41_vm1, %v2121_v9  ;;  %v2128_v10 = vld [vmem:[%s2505_s0 + $0x8] sm:$0xff]  ;;  %v1884_v11 = vpack.c.bf16 %v1469_v8, %v1468_v7  ;;  %v1470_v13 = vld [vmem:[%s2504_s1 + $0x70] sm:$0xff]  ;;  %v1471_v14 = vld [vmem:[%s2504_s1 + $0x78] sm:$0xff]  ;;  %vm575_vm4 = vcmask 31744  }
   0x5   :  { %1879 = vmatpush3.bf16.msra.mxu0 %v1876_v4  ;;  %43 = vst.msk [vmem:[#allocation2 + $0x9] sm:$0xff] %vm41_vm1, %v2128_v10  ;;  %44 = vst.msk [vmem:[#allocation2 + $0x19] sm:$0xff] %vm41_vm1, %v2135_v12  ;;  %v2148_v15 = vld [vmem:[%s2505_s0 + $0x18] sm:$0xff]  ;;  %v1888_v16 = vpack.c.bf16 %v1471_v14, %v1470_v13  ;;  %v50_v18 = vld [vmem:[%s2504_s1] sm:$0xff] }
   0x6   :  { %1881 = vmatprep.subr.bf16.mxu0 %v1880_v6  ;;  %45 = vst.msk [vmem:[#allocation2 + $0x21] sm:$0xff] %vm41_vm1, %v2148_v15  ;;  %v51_v19 = vld [vmem:[%s2504_s1 + $0x8] sm:$0xff]  ;;  %v52_v21 = vld [vmem:[%s2504_s1 + $0x10] sm:$0xff]  ;;  %v53_v22 = vld [vmem:[%s2504_s1 + $0x18] sm:$0xff] }
   0x7   :  { %v1892_v20 = vpack.c.bf16 %v51_v19, %v50_v18  ;;  %v1896_v24 = vpack.c.bf16 %v53_v22, %v52_v21  ;;  %v54_v26 = vld [vmem:[%s2504_s1 + $0x20] sm:$0xff]  ;;  %v55_v27 = vld [vmem:[%s2504_s1 + $0x28] sm:$0xff]  ;;  %v56_v31 = vld [vmem:[%s2504_s1 + $0x30] sm:$0xff] }
   0x8   :  { %v1900_v29 = vpack.c.bf16 %v55_v27, %v54_v26  ;;  %v57_v32 = vld [vmem:[%s2504_s1 + $0x38] sm:$0xff]  ;;  %v1480_v34 = vld [vmem:[%s2504_s1 + $0x80] sm:$0xff]  ;;  %v1481_v35 = vld [vmem:[%s2504_s1 + $0x88] sm:$0xff] }
   0x9   :  { %1883 = vmatpush3.bf16.msra.mxu0 %v1880_v6  ;;  %v1904_v33 = vpack.c.bf16 %v57_v32, %v56_v31  ;;  %v1908_v36 = vpack.c.bf16 %v1481_v35, %v1480_v34  ;;  %v1482_v37 = vld [vmem:[%s2504_s1 + $0x90] sm:$0xff]  ;;  %v1483_v38 = vld [vmem:[%s2504_s1 + $0x98] sm:$0xff]  ;;  %v1484_v42 = vld [vmem:[%s2504_s1 + $0xa0] sm:$0xff] }
   0xa   :  { %1885 = vmatprep.subr.bf16.mxu0 %v1884_v11  ;;  %v1912_v40 = vpack.c.bf16 %v1483_v38, %v1482_v37  ;;  %v1485_v43 = vld [vmem:[%s2504_s1 + $0xa8] sm:$0xff]  ;;  %v1486_v47 = vld [vmem:[%s2504_s1 + $0xb0] sm:$0xff]  ;;  %v1487_v48 = vld [vmem:[%s2504_s1 + $0xb8] sm:$0xff] }
   0xb   :  { %v58_v17 = vld [vmem:[#allocation2 + $0x1] sm:$0xff]  ;;  %v1916_v45 = vpack.c.bf16 %v1485_v43, %v1484_v42  ;;  %v1920_v49 = vpack.c.bf16 %v1487_v48, %v1486_v47  ;;  %v411_v57 = vld [vmem:[%s2506_s7 + $0x10] sm:$0xff]  ;;  %v412_v58 = vld [vmem:[%s2506_s7 + $0x18] sm:$0xff] }
   0xc   :  { %1664 = vmatprep.mubr.msk.f32.mxu0 %vm41_vm1, %v58_v17  ;;  %v59_v23 = vld [vmem:[#allocation2 + $0x9] sm:$0xff]  ;;  %v60_v25 = vld [vmem:[#allocation2 + $0x19] sm:$0xff]  ;;  %v2232_v59 = vpack.c.bf16 %v412_v58, %v411_v57 }
   0xd   :  { %1887 = vmatpush3.bf16.msra.mxu0 %v1884_v11  ;;  %v61_v28 = vld [vmem:[#allocation2 + $0x21] sm:$0xff]  ;;  %v48_v41 = vld [vmem:[#allocation2 + $0x18] sm:$0xff]  ;;  %v266_v50 = vld [vmem:[#allocation2 + $0xa] sm:$0xff] }
   0xe   :  { %1889 = vmatprep.subr.bf16.mxu0 %v1888_v16  ;;  %v46_v30 = vld [vmem:[#allocation2] sm:$0xff]  ;;  %v47_v39 = vld [vmem:[#allocation2 + $0x8] sm:$0xff]  ;;  %v415_v63 = vld [vmem:[%s2506_s7 + $0x30] sm:$0xff] }
   0xf   :  { %v49_v44 = vld [vmem:[#allocation2 + $0x20] sm:$0xff]  ;;  %v410_v54 = vld [vmem:[%s2506_s7 + $0x8] sm:$0xff]  ;;  %v416_v0 = vld [vmem:[%s2506_s7 + $0x38] sm:$0xff] }
  0x10   :  { %v265_v46 = vld [vmem:[#allocation2 + $0x2] sm:$0xff]  ;;  %v267_v51 = vld [vmem:[#allocation2 + $0x1a] sm:$0xff]  ;;  %v2256_v1 = vpack.c.bf16 %v416_v0, %v415_v63  ;;  %v1500_v0 = vld [vmem:[%s2510_s2 + $0x50] sm:$0xff] }
  0x11   :  { %1891 = vmatpush3.bf16.msra.mxu0 %v1888_v16  ;;  %v268_v52 = vld [vmem:[#allocation2 + $0x22] sm:$0xff] }
  0x12   :  { %1893 = vmatprep.subr.bf16.mxu0 %v1892_v20  ;;  %v409_v53 = vld [vmem:[%s2506_s7] sm:$0xff]  ;;  %v414_v61 = vld [vmem:[%s2506_s7 + $0x28] sm:$0xff] }
  0x13   :  { %v2218_v55 = vpack.c.bf16 %v410_v54, %v409_v53  ;;  %v413_v60 = vld [vmem:[%s2506_s7 + $0x20] sm:$0xff] }
  0x14   :  { %1665 = vmatmul.mubr.msk.f32.vlgmr.msra.gmra.mrb[0].mxu0 %vm41_vm1, %v59_v23  ;;  %v2244_v62 = vpack.c.bf16 %v414_v61, %v413_v60  ;;  %v571_v54 = vld [vmem:[%s2509_s4] sm:$0x1]  ;;  %v1499_v61 = vld [vmem:[%s2510_s2 + $0x48] sm:$0xff] }
  0x15   :  { %1895 = vmatpush3.bf16.msra.mxu0 %v1892_v20  ;;  %1667 = vmatprep.mubr.msk.f32.mxu0 %vm41_vm1, %v60_v25  ;;  %v1498_v60 = vld [vmem:[%s2510_s2 + $0x40] sm:$0xff] }
  0x16   :  { %1897 = vmatprep.subr.bf16.mxu0 %v1896_v24  ;;  %1926 = vmatpush3.bf16.msra.mxu1 %v2218_v55  ;;  %v1948_v63 = vpack.c.bf16 %v1499_v61, %v1498_v60  ;;  %v1517_v60 = vld [vmem:[%s2510_s2 + $0x98] sm:$0xff] }
  0x17   :  { %1927 = vmatprep.subr.bf16.mxu1 %v2044_v56 }
  0x18   :  { %1668 = vmatmul.mubr.msk.f32.gmra.mrb[2].mxu0 %vm41_vm1, %v61_v28 }
  0x19   :  { %1899 = vmatpush3.bf16.msra.mxu0 %v1896_v24  ;;  %1686 = vmatprep.mubr.msk.f32.mxu0 %vm41_vm1, %v46_v30 }
  0x1a   :  { %1901 = vmatprep.subr.bf16.mxu0 %v1900_v29  ;;  %1929 = vmatpush3.bf16.msra.mxu1 %v2232_v59 }
  0x1b   :  { %1930 = vmatprep.subr.bf16.mxu1 %v2044_v56 }
  0x1d   :  { %1903 = vmatpush3.bf16.msra.mxu0 %v1900_v29 }
  0x1e   :  { %1905 = vmatprep.subr.bf16.mxu0 %v1904_v33  ;;  %1932 = vmatpush3.bf16.msra.mxu1 %v2244_v62 }
  0x1f   :  { %1933 = vmatprep.subr.bf16.mxu1 %v2044_v56 }
  0x21   :  { %1907 = vmatpush3.bf16.msra.mxu0 %v1904_v33 }
  0x22   :  { %1909 = vmatprep.subr.bf16.mxu0 %v1908_v36  ;;  %1935 = vmatpush3.bf16.msra.mxu1 %v2256_v1 }
  0x23   :  { %1936 = vmatprep.subr.bf16.mxu1 %v2044_v56 }
  0x24   :  { %1687 = vmatmul.mubr.msk.f32.vlgmr.msra.gmra.mrb[0].mxu0 %vm41_vm1, %v47_v39 }
  0x25   :  { %1911 = vmatpush3.bf16.msra.mxu0 %v1908_v36  ;;  %1689 = vmatprep.mubr.msk.f32.mxu0 %vm41_vm1, %v48_v41  ;;  %v574_v41 = vld [vmem:[%s2507_s8] sm:$0xf] }
  0x26   :  { %1913 = vmatprep.subr.bf16.mxu0 %v1912_v40 }
  0x28   :  { %1690 = vmatmul.mubr.msk.f32.gmra.mrb[2].mxu0 %vm41_vm1, %v49_v44 }
  0x29   :  { %1915 = vmatpush3.bf16.msra.mxu0 %v1912_v40  ;;  %1708 = vmatprep.mubr.msk.f32.mxu0 %vm41_vm1, %v265_v46 }
  0x2a   :  { %1917 = vmatprep.subr.bf16.mxu0 %v1916_v45 }
  0x2d   :  { %1919 = vmatpush3.bf16.msra.mxu0 %v1916_v45 }
  0x2e   :  { %1921 = vmatprep.subr.bf16.mxu0 %v1920_v49 }
  0x31   :  { %1923 = vmatpush3.bf16.msra.mxu0 %v1920_v49 }
  0x32   :  { %1996 = vmatprep.subr.bf16.mxu0 %v2044_v56 }
  0x34   :  { %1709 = vmatmul.mubr.msk.f32.vlgmr.msra.gmra.mrb[0].mxu0 %vm41_vm1, %v266_v50 }
  0x35   :  { %1711 = vmatprep.mubr.msk.f32.mxu0 %vm41_vm1, %v267_v51  ;;  %1998 = vmatpush3.bf16.msra.mxu0 %v2218_v55  ;;  %v567_v51 = vld [vmem:[%s2508_s3] sm:$0x1] }
  0x36   :  { %1999 = vmatprep.subr.bf16.mxu0 %v2044_v56 }
  0x38   :  { %1712 = vmatmul.mubr.msk.f32.gmra.mrb[2].mxu0 %vm41_vm1, %v268_v52 }
  0x39   :  { %2001 = vmatpush3.bf16.msra.mxu0 %v2232_v59  ;;  %1844 = vmatprep.mubr.msk.f32.mxu0 %vm2045_vm2, %v2043_v3 }
  0x3a   :  { %2002 = vmatprep.subr.bf16.mxu0 %v2044_v56 }
  0x3d   :  { %2004 = vmatpush3.bf16.msra.mxu0 %v2244_v62 }
  0x3e   :  { %2005 = vmatprep.subr.bf16.mxu0 %v2044_v56 }
  0x41   :  { %2007 = vmatpush3.bf16.msra.mxu0 %v2256_v1 }
  0x42   :  { %2008 = vmatprep.subr.bf16.mxu0 %v2044_v56 }
 0x107   :  { %v2266_v2 = vpop.f32.mrb[0].mxu0 }
 0x108   :  { %v380_v4 = vsel %vm41_vm1, %v2266_v2, 0.0  ;;  %v393_v5 = vmul.f32 %v2266_v2, %v2266_v2  ;;  %v2272_v6 = vpop.f32.mrb[1].mxu0 }
 0x109   :  { %v379_v7 = vsel %vm41_vm1, %v2272_v6, 0.0  ;;  %v392_v8 = vmul.f32 %v2272_v6, %v2272_v6 }
 0x10a   :  { %v397_v11 = vsel %vm41_vm1, %v393_v5, 0.0  ;;  %v381_v13 = vadd.f32 %v380_v4, %v379_v7  ;;  %v1501_v4 = vld [vmem:[%s2510_s2 + $0x58] sm:$0xff]  ;;  %v1502_v7 = vld [vmem:[%s2510_s2 + $0x60] sm:$0xff] }
 0x10b   :  { %v396_v14 = vsel %vm41_vm1, %v392_v8, 0.0  ;;  %v2280_v16 = vpop.f32.mrb[2].mxu0  ;;  %v1952_v5 = vpack.c.bf16 %v1501_v4, %v1500_v0  ;;  %v1503_v8 = vld [vmem:[%s2510_s2 + $0x68] sm:$0xff]  ;;  %v1518_v0 = vld [vmem:[%s2510_s2 + $0xa0] sm:$0xff] }
 0x10c   :  { %v398_v17 = vadd.f32 %v397_v11, %v396_v14  ;;  %v2282_v18 = vpop.f32.mrb[3].mxu0  ;;  %v395_v19 = vmul.f32 %v2280_v16, %v2280_v16  ;;  %v384_v23 = vsel %vm41_vm1, %v2280_v16, 0.0  ;;  %v1956_v11 = vpack.c.bf16 %v1503_v8, %v1502_v7  ;;  %v1505_v14 = vld [vmem:[%s2510_s2 + $0x78] sm:$0xff]  ;;  %v1519_v4 = vld [vmem:[%s2510_s2 + $0xa8] sm:$0xff] }
 0x10d   :  { %v382_v20 = vsel %vm41_vm1, %v2282_v18, 0.0  ;;  %v394_v21 = vmul.f32 %v2282_v18, %v2282_v18  ;;  %v1988_v7 = vpack.c.bf16 %v1519_v4, %v1518_v0  ;;  %v1275_v4 = vld [vmem:[%s2512_s6] sm:$0x1] }
 0x10e   :  { %v383_v22 = vadd.f32 %v382_v20, %v381_v13  ;;  %v401_v27 = vsel %vm41_vm1, %v395_v19, 0.0  ;;  %v1504_v13 = vld [vmem:[%s2510_s2 + $0x70] sm:$0xff]  ;;  %v754_v19 = vld [vmem:[%s2510_s2] sm:$0xff]  ;;  %v755_v20 = vld [vmem:[%s2510_s2 + $0x8] sm:$0xff] }
 0x10f   :  { %v399_v24 = vsel %vm41_vm1, %v394_v21, 0.0  ;;  %v1964_v21 = vpack.c.bf16 %v755_v20, %v754_v19 }
 0x110   :  { %v385_v25 = vadd.f32 %v384_v23, %v383_v22  ;;  %v400_v26 = vadd.f32 %v399_v24, %v398_v17  ;;  %v1960_v17 = vpack.c.bf16 %v1505_v14, %v1504_v13  ;;  %v726_v22 = vlaneseq  ;;  %v1521_v13 = vld [vmem:[%s2510_s2 + $0xb8] sm:$0xff] }
 0x112   :  { %v386_v28 = vrot.slane %v385_v25, 4  ;;  %v402_v29 = vadd.f32 %v401_v27, %v400_v26  ;;  %v727_v23 = vshrl.u32 %v726_v22, 7 }
 0x114   :  { %v387_v30 = vadd.f32 %v386_v28, %v385_v25  ;;  %v403_v32 = vrot.slane %v402_v29, 4  ;;  %v2354_v24 = vsub.s32 0, %v727_v23 }
 0x116   :  { %v388_v31 = vrot.slane %v387_v30, 2  ;;  %v404_v35 = vadd.f32 %v403_v32, %v402_v29 }
 0x118   :  { %v389_v33 = vadd.f32 %v388_v31, %v387_v30  ;;  %v405_v37 = vrot.slane %v404_v35, 2 }
 0x11a   :  { %v390_v34 = vrot.slane %v389_v33, 1  ;;  %v406_v38 = vadd.f32 %v405_v37, %v404_v35 }
 0x11c   :  { %v391_v36 = vadd.f32 %v390_v34, %v389_v33  ;;  %v407_v39 = vrot.slane %v406_v38, 1 }
 0x11e   :  { %1731 = vmatmul.mubr.msk.f32.vlgmr.msra.gmra.mrb[0].mxu1 %vm41_vm1, %v391_v36  ;;  %v408_v40 = vadd.f32 %v407_v39, %v406_v38 }
 0x11f   :  { %1938 = vmatpush3.bf16.msra.mxu1 %v2218_v55  ;;  %1749 = vmatprep.mubr.msk.f32.mxu1 %vm2045_vm2, %v2043_v3 }
 0x120   :  { %1939 = vmatprep.subr.bf16.mxu1 %v2044_v56 }
 0x123   :  { %1941 = vmatpush3.bf16.msra.mxu1 %v2232_v59 }
 0x124   :  { %1942 = vmatprep.subr.bf16.mxu1 %v2044_v56 }
 0x127   :  { %1944 = vmatpush3.bf16.msra.mxu1 %v2244_v62 }
 0x128   :  { %1945 = vmatprep.subr.bf16.mxu1 %v2044_v56 }
 0x12b   :  { %1947 = vmatpush3.bf16.msra.mxu1 %v2256_v1 }
 0x12c   :  { %1752 = vmatprep.subr.mxu1 %v2043_v3 }
 0x12e   :  { %1750 = vmatmul.mubr.msk.f32.vlgmr.msra.gmra.mrb[2].mxu1 %vm41_vm1, %v408_v40 }
 0x12f   :  { %1754 = vmatprep.mubr.msk.f32.mxu1 %vm2045_vm2, %v2043_v3  ;;  %1753 = vmatpush3.msk.msra.mxu1 %vm579_vm3, %v574_v41 }
 0x130   :  { %1757 = vmatprep.subr.mxu1 %v2043_v3 }
 0x1f1   :  { %v486_v42 = vpop.f32.mrb[0].mxu1 }
 0x1f2   :  { %v1732_v43 = vpop.f32.mrb[1].mxu1  ;;  %v563_v44 = vmul.f32 0.001953125, %v486_v42 }
 0x1f4   :  { %v565_v46 = vmul.f32 %v563_v44, %v563_v44 }
 0x201   :  { %v559_v45 = vpop.f32.mrb[2].mxu1 }
 0x202   :  { %v564_v47 = vmul.f32 0.001953125, %v559_v45  ;;  %v1751_v48 = vpop.f32.mrb[3].mxu1  ;;  %v759_v45 = vld [vmem:[%s2510_s2 + $0x28] sm:$0xff] }
 0x204   :  { %v566_v49 = vsub.f32 %v564_v47, %v565_v46 }
 0x206   :  { %v568_v50 = vadd.f32 1e-05, %v566_v49  ;;  %v760_v49 = vld [vmem:[%s2510_s2 + $0x30] sm:$0xff] }
 0x208   :  { %2039 = vrsqrt.f32 %v568_v50  ;;  %v761_v50 = vld [vmem:[%s2510_s2 + $0x38] sm:$0xff] }
 0x212   :  { %v2040_v52 = vpop.eup %2039 }
 0x213   :  { %v570_v53 = vmul.f32 %v2040_v52, %v567_v51  ;;  %v1976_v52 = vpack.c.bf16 %v761_v50, %v760_v49 }
 0x215   :  { %1755 = vmatmul.mubr.msk.f32.vlgmr.msra.gmra.mrb[4].mxu1 %vm575_vm4, %v570_v53  ;;  %v572_v57 = vmul.f32 %v570_v53, %v563_v44  ;;  %v758_v44 = vld [vmem:[%s2510_s2 + $0x20] sm:$0xff] }
 0x216   :  { %1758 = vmatpush3.msk.msra.mxu1 %vm579_vm3, %v574_v41  ;;  %1759 = vmatprep.mubr.msk.f32.mxu1 %vm2045_vm2, %v2043_v3  ;;  %v1972_v47 = vpack.c.bf16 %v759_v45, %v758_v44  ;;  %v1514_v53 = vld [vmem:[%s2510_s2 + $0x80] sm:$0xff] }
 0x217   :  { %v573_v58 = vsub.f32 %v571_v54, %v572_v57  ;;  %1949 = vmatprep.subr.bf16.mxu1 %v1948_v63  ;;  %v1515_v54 = vld [vmem:[%s2510_s2 + $0x88] sm:$0xff] }
 0x218   :  { %v1980_v57 = vpack.c.bf16 %v1515_v54, %v1514_v53 }
 0x219   :  { %1760 = vmatmul.mubr.msk.f32.vlgmr.msra.gmra.mrb[6].mxu1 %vm575_vm4, %v573_v58  ;;  %v1516_v58 = vld [vmem:[%s2510_s2 + $0x90] sm:$0xff] }
 0x21a   :  { %1951 = vmatpush3.bf16.msra.mxu1 %v1948_v63  ;;  %v1984_v61 = vpack.c.bf16 %v1517_v60, %v1516_v58 }
 0x21b   :  { %1953 = vmatprep.subr.bf16.mxu1 %v1952_v5 }
 0x21e   :  { %1955 = vmatpush3.bf16.msra.mxu1 %v1952_v5 }
 0x21f   :  { %1957 = vmatprep.subr.bf16.mxu1 %v1956_v11 }
 0x222   :  { %1959 = vmatpush3.bf16.msra.mxu1 %v1956_v11  ;;  %v1520_v11 = vld [vmem:[%s2510_s2 + $0xb0] sm:$0xff] }
 0x223   :  { %1961 = vmatprep.subr.bf16.mxu1 %v1960_v17 }
 0x226   :  { %1963 = vmatpush3.bf16.msra.mxu1 %v1960_v17  ;;  %v1992_v17 = vpack.c.bf16 %v1521_v13, %v1520_v11 }
 0x227   :  { %1965 = vmatprep.subr.bf16.mxu1 %v1964_v21 }
 0x2e8   :  { %v649_v25 = vpop.f32.mrb[4].mxu1 }
 0x2e9   :  { %v729_v26 = vrot.slane %v649_v25, %v2354_v24  ;;  %v1756_v27 = vpop.f32.mrb[5].mxu1 }
 0x2eb   :  { %v730_v28 = vmul.f32 %v729_v26, %v2272_v6  ;;  %v731_v29 = vmul.f32 %v2266_v2, %v729_v26  ;;  %v732_v30 = vmul.f32 %v729_v26, %v2282_v18  ;;  %v733_v31 = vmul.f32 %v2280_v16, %v729_v26  ;;  %v756_v2 = vld [vmem:[%s2510_s2 + $0x10] sm:$0xff]  ;;  %v757_v6 = vld [vmem:[%s2510_s2 + $0x18] sm:$0xff] }
 0x2ec   :  { %v722_v32 = vpop.f32.mrb[6].mxu1  ;;  %v1968_v43 = vpack.c.bf16 %v757_v6, %v756_v2 }
 0x2ed   :  { %v737_v33 = vrot.slane %v722_v32, %v2354_v24  ;;  %v1761_v34 = vpop.f32.mrb[7].mxu1 }
 0x2ef   :  { %v738_v35 = vadd.f32 %v737_v33, %v730_v28  ;;  %v739_v36 = vadd.f32 %v737_v33, %v731_v29  ;;  %v740_v37 = vadd.f32 %v737_v33, %v732_v30  ;;  %v741_v38 = vadd.f32 %v737_v33, %v733_v31 }
 0x2f1   :  { %v742_v39 = vmax.f32 %v738_v35, 0.0  ;;  %v743_v40 = vmax.f32 %v739_v36, 0.0  ;;  %v744_v41 = vmax.f32 %v740_v37, 0.0  ;;  %v745_v42 = vmax.f32 %v741_v38, 0.0 }
 0x2f3   :  { %746 = vst.msk [vmem:[#allocation2 + $0x1] sm:$0xff] %vm41_vm1, %v742_v39  ;;  %747 = vst.msk [vmem:[#allocation2 + $0x9] sm:$0xff] %vm41_vm1, %v743_v40 }
 0x2f4   :  { %748 = vst.msk [vmem:[#allocation2 + $0x19] sm:$0xff] %vm41_vm1, %v744_v41  ;;  %749 = vst.msk [vmem:[#allocation2 + $0x21] sm:$0xff] %vm41_vm1, %v745_v42 }
 0x2fa   :  { %v762_v16 = vld [vmem:[#allocation2 + $0x1] sm:$0xff]  ;;  %v763_v18 = vld [vmem:[#allocation2 + $0x9] sm:$0xff] }
 0x2fb   :  { %1778 = vmatprep.mubr.msk.f32.mxu1 %vm41_vm1, %v762_v16  ;;  %v764_v46 = vld [vmem:[#allocation2 + $0x19] sm:$0xff]  ;;  %v765_v48 = vld [vmem:[#allocation2 + $0x21] sm:$0xff]  ;;  %v970_v19 = vld [vmem:[#allocation2 + $0xa] sm:$0xff] }
 0x2fc   :  { %1779 = vmatmul.mubr.msk.f32.vlgmr.msra.gmra.mrb[8].mxu1 %vm41_vm1, %v763_v18  ;;  %v750_v51 = vld [vmem:[#allocation2] sm:$0xff]  ;;  %v751_v63 = vld [vmem:[#allocation2 + $0x8] sm:$0xff]  ;;  %v752_v5 = vld [vmem:[#allocation2 + $0x18] sm:$0xff] }
 0x2fd   :  { %1967 = vmatpush3.bf16.msra.mxu1 %v1964_v21  ;;  %1781 = vmatprep.mubr.msk.f32.mxu1 %vm41_vm1, %v764_v46  ;;  %v753_v8 = vld [vmem:[#allocation2 + $0x20] sm:$0xff] }
 0x2fe   :  { %1969 = vmatprep.subr.bf16.mxu1 %v1968_v43  ;;  %v969_v14 = vld [vmem:[#allocation2 + $0x2] sm:$0xff]  ;;  %v971_v20 = vld [vmem:[#allocation2 + $0x1a] sm:$0xff] }
 0x2ff   :  { %v972_v21 = vld [vmem:[#allocation2 + $0x22] sm:$0xff] }
 0x300   :  { %1782 = vmatmul.mubr.msk.f32.gmra.mrb[10].mxu1 %vm41_vm1, %v765_v48 }
 0x301   :  { %1971 = vmatpush3.bf16.msra.mxu1 %v1968_v43  ;;  %1800 = vmatprep.mubr.msk.f32.mxu1 %vm41_vm1, %v750_v51 }
 0x302   :  { %1973 = vmatprep.subr.bf16.mxu1 %v1972_v47 }
 0x305   :  { %1975 = vmatpush3.bf16.msra.mxu1 %v1972_v47 }
 0x306   :  { %1977 = vmatprep.subr.bf16.mxu1 %v1976_v52 }
 0x309   :  { %1979 = vmatpush3.bf16.msra.mxu1 %v1976_v52 }
 0x30a   :  { %1981 = vmatprep.subr.bf16.mxu1 %v1980_v57 }
 0x30c   :  { %1801 = vmatmul.mubr.msk.f32.vlgmr.msra.gmra.mrb[8].mxu1 %vm41_vm1, %v751_v63 }
 0x30d   :  { %1803 = vmatprep.mubr.msk.f32.mxu1 %vm41_vm1, %v752_v5  ;;  %1983 = vmatpush3.bf16.msra.mxu1 %v1980_v57 }
 0x30e   :  { %1985 = vmatprep.subr.bf16.mxu1 %v1984_v61 }
 0x310   :  { %1804 = vmatmul.mubr.msk.f32.gmra.mrb[10].mxu1 %vm41_vm1, %v753_v8 }
 0x311   :  { %1987 = vmatpush3.bf16.msra.mxu1 %v1984_v61  ;;  %1822 = vmatprep.mubr.msk.f32.mxu1 %vm41_vm1, %v969_v14  ;;  %v1271_v61 = vld [vmem:[%s2511_s5] sm:$0x1] }
 0x312   :  { %1989 = vmatprep.subr.bf16.mxu1 %v1988_v7 }
 0x315   :  { %1991 = vmatpush3.bf16.msra.mxu1 %v1988_v7 }
 0x316   :  { %1993 = vmatprep.subr.bf16.mxu1 %v1992_v17 }
 0x319   :  { %1995 = vmatpush3.bf16.msra.mxu1 %v1992_v17 }
 0x31c   :  { %1823 = vmatmul.mubr.msk.f32.vlgmr.msra.gmra.mrb[8].mxu1 %vm41_vm1, %v970_v19 }
 0x31d   :  { %1825 = vmatprep.mubr.msk.f32.mxu1 %vm41_vm1, %v971_v20 }
 0x320   :  { %1826 = vmatmul.mubr.msk.f32.gmra.mrb[10].mxu1 %vm41_vm1, %v972_v21 }
 0x3ef   :  { %v2420_v22 = vpop.f32.mrb[8].mxu1 }
 0x3f0   :  { %v1084_v23 = vsel %vm41_vm1, %v2420_v22, 0.0  ;;  %v1097_v25 = vmul.f32 %v2420_v22, %v2420_v22  ;;  %v2426_v26 = vpop.f32.mrb[9].mxu1 }
 0x3f1   :  { %v1083_v27 = vsel %vm41_vm1, %v2426_v26, 0.0  ;;  %v1096_v28 = vmul.f32 %v2426_v26, %v2426_v26 }
 0x3f2   :  { %v1101_v29 = vsel %vm41_vm1, %v1097_v25, 0.0  ;;  %v1085_v30 = vadd.f32 %v1084_v23, %v1083_v27 }
 0x3f3   :  { %v1100_v31 = vsel %vm41_vm1, %v1096_v28, 0.0  ;;  %v2434_v32 = vpop.f32.mrb[10].mxu1 }
 0x3f4   :  { %v1102_v33 = vadd.f32 %v1101_v29, %v1100_v31  ;;  %v2436_v34 = vpop.f32.mrb[11].mxu1  ;;  %v1099_v35 = vmul.f32 %v2434_v32, %v2434_v32  ;;  %v1088_v39 = vsel %vm41_vm1, %v2434_v32, 0.0 }
 0x3f5   :  { %v1086_v36 = vsel %vm41_vm1, %v2436_v34, 0.0  ;;  %v1098_v37 = vmul.f32 %v2436_v34, %v2436_v34 }
 0x3f6   :  { %v1087_v38 = vadd.f32 %v1086_v36, %v1085_v30  ;;  %v1105_v2 = vsel %vm41_vm1, %v1099_v35, 0.0 }
 0x3f7   :  { %v1103_v40 = vsel %vm41_vm1, %v1098_v37, 0.0 }
 0x3f8   :  { %v1089_v41 = vadd.f32 %v1088_v39, %v1087_v38  ;;  %v1104_v42 = vadd.f32 %v1103_v40, %v1102_v33 }
 0x3fa   :  { %v1090_v6 = vrot.slane %v1089_v41, 4  ;;  %v1106_v16 = vadd.f32 %v1105_v2, %v1104_v42 }
 0x3fc   :  { %v1091_v18 = vadd.f32 %v1090_v6, %v1089_v41  ;;  %v1107_v45 = vrot.slane %v1106_v16, 4 }
 0x3fe   :  { %v1092_v43 = vrot.slane %v1091_v18, 2  ;;  %v1108_v48 = vadd.f32 %v1107_v45, %v1106_v16 }
 0x400   :  { %v1093_v44 = vadd.f32 %v1092_v43, %v1091_v18  ;;  %v1109_v49 = vrot.slane %v1108_v48, 2 }
 0x402   :  { %v1094_v46 = vrot.slane %v1093_v44, 1  ;;  %v1110_v50 = vadd.f32 %v1109_v49, %v1108_v48 }
 0x404   :  { %v1095_v47 = vadd.f32 %v1094_v46, %v1093_v44  ;;  %v1111_v51 = vrot.slane %v1110_v50, 1 }
 0x406   :  { %1845 = vmatmul.mubr.msk.f32.vlgmr.msra.gmra.mrb[4].mxu0 %vm41_vm1, %v1095_v47  ;;  %v1112_v52 = vadd.f32 %v1111_v51, %v1110_v50 }
 0x407   :  { %2010 = vmatpush3.bf16.msra.mxu0 %v2218_v55  ;;  %1863 = vmatprep.mubr.msk.f32.mxu0 %vm2045_vm2, %v2043_v3  ;;  %v1278_v55 = vld [vmem:[%s2507_s8] sm:$0xf] }
 0x408   :  { %2011 = vmatprep.subr.bf16.mxu0 %v2044_v56 }
 0x40b   :  { %2013 = vmatpush3.bf16.msra.mxu0 %v2232_v59 }
 0x40c   :  { %2014 = vmatprep.subr.bf16.mxu0 %v2044_v56 }
 0x40f   :  { %2016 = vmatpush3.bf16.msra.mxu0 %v2244_v62 }
 0x410   :  { %2017 = vmatprep.subr.bf16.mxu0 %v2044_v56 }
 0x413   :  { %2019 = vmatpush3.bf16.msra.mxu0 %v2256_v1 }
 0x414   :  { %1866 = vmatprep.subr.mxu0 %v2043_v3 }
 0x416   :  { %1864 = vmatmul.mubr.msk.f32.vlgmr.msra.gmra.mrb[6].mxu0 %vm41_vm1, %v1112_v52 }
 0x417   :  { %1868 = vmatprep.mubr.msk.f32.mxu0 %vm2045_vm2, %v2043_v3  ;;  %1867 = vmatpush3.msk.msra.mxu0 %vm579_vm3, %v1278_v55 }
 0x418   :  { %1871 = vmatprep.subr.mxu0 %v2043_v3 }
 0x4d9   :  { %v1190_v59 = vpop.f32.mrb[4].mxu0 }
 0x4da   :  { %v1846_v56 = vpop.f32.mrb[5].mxu0  ;;  %v1267_v62 = vmul.f32 0.001953125, %v1190_v59 }
 0x4dc   :  { %v1269_v53 = vmul.f32 %v1267_v62, %v1267_v62 }
 0x4e9   :  { %v1263_v1 = vpop.f32.mrb[6].mxu0 }
 0x4ea   :  { %v1268_v54 = vmul.f32 0.001953125, %v1263_v1  ;;  %v1865_v57 = vpop.f32.mrb[7].mxu0 }
 0x4ec   :  { %v1270_v58 = vsub.f32 %v1268_v54, %v1269_v53 }
 0x4ee   :  { %v1272_v60 = vadd.f32 1e-05, %v1270_v58 }
 0x4f0   :  { %2041 = vrsqrt.f32 %v1272_v60 }
 0x4fa   :  { %v2042_v63 = vpop.eup %2041 }
 0x4fb   :  { %v1274_v0 = vmul.f32 %v2042_v63, %v1271_v61 }
 0x4fd   :  { %1869 = vmatmul.mubr.msk.f32.vlgmr.msra.gmra.mrb[8].mxu0 %vm575_vm4, %v1274_v0  ;;  %v1276_v5 = vmul.f32 %v1274_v0, %v1267_v62 }
 0x4fe   :  { %1872 = vmatpush3.msk.msra.mxu0 %vm579_vm3, %v1278_v55  ;;  %1873 = vmatprep.mubr.msk.f32.mxu0 %vm2045_vm2, %v2043_v3 }
 0x4ff   :  { %v1277_v7 = vsub.f32 %v1275_v4, %v1276_v5 }
 0x501   :  { %1874 = vmatmul.mubr.msk.f32.vlgmr.msra.gmra.mrb[10].mxu0 %vm575_vm4, %v1277_v7 }
 0x5d0   :  { %v1351_v8 = vpop.f32.mrb[8].mxu0 }
 0x5d1   :  { %v1431_v11 = vrot.slane %v1351_v8, %v2354_v24  ;;  %v1870_v13 = vpop.f32.mrb[9].mxu0 }
 0x5d3   :  { %v1432_v14 = vmul.f32 %v1431_v11, %v2426_v26  ;;  %v1433_v17 = vmul.f32 %v2420_v22, %v1431_v11  ;;  %v1434_v19 = vmul.f32 %v1431_v11, %v2436_v34  ;;  %v1435_v20 = vmul.f32 %v2434_v32, %v1431_v11 }
 0x5d4   :  { %v1424_v21 = vpop.f32.mrb[10].mxu0 }
 0x5d5   :  { %v1439_v23 = vrot.slane %v1424_v21, %v2354_v24  ;;  %v1875_v25 = vpop.f32.mrb[11].mxu0 }
 0x5d7   :  { %v1440_v3 = vadd.f32 %v1439_v23, %v1432_v14  ;;  %v1441_v27 = vadd.f32 %v1439_v23, %v1433_v17  ;;  %v1442_v28 = vadd.f32 %v1439_v23, %v1434_v19  ;;  %v1443_v29 = vadd.f32 %v1439_v23, %v1435_v20 }
 0x5d9   :  { %v1448_v30 = vadd.f32 %v1440_v3, %v2121_v9  ;;  %v1449_v31 = vadd.f32 %v1441_v27, %v2128_v10  ;;  %v1450_v26 = vadd.f32 %v1442_v28, %v2135_v12  ;;  %v1451_v22 = vadd.f32 %v1443_v29, %v2148_v15 }
 0x5db   :  { %v1452_v33 = vmax.f32 %v1448_v30, 0.0  ;;  %v1453_v34 = vmax.f32 %v1449_v31, 0.0  ;;  %v1454_v35 = vmax.f32 %v1450_v26, 0.0  ;;  %v1455_v32 = vmax.f32 %v1451_v22, 0.0 }
 0x5dd   :  { %1456 = vst.msk [vmem:[%s2513_s9] sm:$0xff] %vm41_vm1, %v1452_v33  ;;  %1457 = vst.msk [vmem:[%s2513_s9 + $0x8] sm:$0xff] %vm41_vm1, %v1453_v34 }
 0x5de   :  { %1458 = vst.msk [vmem:[%s2513_s9 + $0x10] sm:$0xff] %vm41_vm1, %v1454_v35  ;;  %1459 = vst.msk [vmem:[%s2513_s9 + $0x18] sm:$0xff] %vm41_vm1, %v1455_v32 }

</bundles_post_ra>
